<compile_context>
chip_gen: v5e
topology: v5e:2x2
jax: 0.10.0
libtpu: 0.0.40
codegen_flags: <defaults>
</compile_context>

<pallas_src>
import math

import numpy as np
import jax
import jax.numpy as jnp
from jax.experimental import pallas as pl
from jax.experimental.pallas import tpu as pltpu


def _round_up(x, m):
    return ((x + m - 1) // m) * m


def _embeddings_kernel(ids_ref,   # VMEM (TM, 1)        int32 token ids
                       emb_ref,   # VMEM (V_pad, E_pad) embedding table (invariant)
                       w_ref,     # VMEM (E_pad, H_pad) scale * fc weight (invariant)
                       pos_ref,   # VMEM (TM, H_pad)    precomputed pe@W + b per token
                       out_ref):  # VMEM (TM, H_pad)    output tile
    """One token tile: one-hot gather (MXU) -> fc matmul (MXU) -> + pos/bias (VPU)."""
    ids = ids_ref[...]                                     # (TM, 1) int32
    tm = ids.shape[0]
    v_pad = emb_ref.shape[0]

    # One-hot embedding lookup on the MXU. Padded / out-of-range ids match no
    # column and just produce a zero row — no OOB reads are possible.
    one_hot = (jax.lax.broadcasted_iota(jnp.int32, (tm, v_pad), 1) == ids
               ).astype(jnp.float32)                       # (TM, V_pad)
    gathered = jnp.dot(one_hot, emb_ref[...],
                       preferred_element_type=jnp.float32)  # (TM, E_pad)

    # w_ref already holds scale*W; pos_ref holds (pe @ W + b) for each token.
    y = jnp.dot(gathered, w_ref[...],
                preferred_element_type=jnp.float32) + pos_ref[...]

    # TODO(synk): nn.Dropout treated as identity (inference / eval mode).
    out_ref[...] = y.astype(jnp.float32)


def make_positional_encoding(max_len, emb_dim):
    """Same buffer as PositionalEncoding.__init__ (without the batch dim)."""
    position = jnp.arange(max_len, dtype=jnp.float32)[:, None]
    div_term = jnp.exp(
        jnp.arange(0, emb_dim, 2, dtype=jnp.float32)
        * -(math.log(10000.0) / emb_dim))
    angles = position * div_term                     # (max_len, emb_dim // 2)
    pe = jnp.zeros((max_len, emb_dim), jnp.float32)
    pe = pe.at[:, 0::2].set(jnp.sin(angles))
    pe = pe.at[:, 1::2].set(jnp.cos(angles))
    return pe


def _build_call(n_tiles, tm, n_pad, v_pad, e_pad, h_pad, invariant_mode):
    inv_kwargs = {} if invariant_mode is None else {"pipeline_mode": invariant_mode}
    return pl.pallas_call(
        _embeddings_kernel,
        out_shape=jax.ShapeDtypeStruct((n_pad, h_pad), jnp.float32),
        grid=(n_tiles,),
        in_specs=[
            pl.BlockSpec((tm, 1), lambda i: (i, 0)),                        # ids
            pl.BlockSpec((v_pad, e_pad), lambda i: (0, 0), **inv_kwargs),   # emb
            pl.BlockSpec((e_pad, h_pad), lambda i: (0, 0), **inv_kwargs),   # scale*W
            pl.BlockSpec((tm, h_pad), lambda i: (i, 0)),                    # pe@W + b
        ],
        out_specs=pl.BlockSpec((tm, h_pad), lambda i: (i, 0)),
        compiler_params=pltpu.CompilerParams(
            dimension_semantics=("parallel",),       # shard token tiles across TCs
            vmem_limit_bytes=64 * 1024 * 1024,       # safe on v5e/v6e/v7x
        ),
    )


def embeddings_forward(token_ids, emb_table, pe, w, bias, *, scale,
                       token_tile=128):
    """Embeddings.forward (fc path; dropout = identity / eval mode)."""
    B, S = token_ids.shape
    V, E = emb_table.shape
    H = w.shape[1]

    N = B * S
    n_tiles = int(pl.cdiv(N, token_tile))
    n_pad = n_tiles * token_tile
    v_pad = _round_up(V, 128)
    e_pad = _round_up(E, 128)
    h_pad = _round_up(H, 128)

    # Fold:  (emb*scale + pe) @ W + b  ==  emb @ (scale*W) + (pe @ W + b).
    # pe@W+b is position-only, so it is computed once here (accurate f32 dot).
    w_scaled = w.astype(jnp.float32) * jnp.float32(scale)            # (E, H)
    pos_proj = jnp.dot(pe[:S].astype(jnp.float32), w.astype(jnp.float32),
                       precision=jax.lax.Precision.HIGHEST) + bias   # (S, H)
    pos_tok = jnp.tile(pos_proj, (B, 1))                             # (B*S, H)

    # Zero-pad to lane-dense (multiple-of-128) shapes. Padded vocab rows are
    # never selected, padded E/H lanes contribute exactly zero, padded token
    # rows are sliced off at the end.
    ids_p = jnp.pad(token_ids.reshape(N, 1).astype(jnp.int32),
                    ((0, n_pad - N), (0, 0)))
    emb_p = jnp.pad(emb_table.astype(jnp.float32),
                    ((0, v_pad - V), (0, e_pad - E)))
    w_p = jnp.pad(w_scaled, ((0, e_pad - E), (0, h_pad - H)))
    pos_p = jnp.pad(pos_tok.astype(jnp.float32),
                    ((0, n_pad - N), (0, h_pad - H)))

    args = (ids_p, emb_p, w_p, pos_p)
    try:
        # Single-buffer the grid-invariant operands (constant index_map):
        # a second pipeline buffer for them is pure VMEM waste.
        out_p = _build_call(n_tiles, token_tile, n_pad, v_pad, e_pad, h_pad,
                            pl.Buffered(1))(*args)
    except Exception:
        # Fallback for jax builds without single-buffer pipeline_mode on TPU;
        # the (small) invariants are then double-buffered, which is still correct.
        out_p = _build_call(n_tiles, token_tile, n_pad, v_pad, e_pad, h_pad,
                            None)(*args)

    return out_p[:N, :H].reshape(B, S, H)


if __name__ == "__main__":
    # Synthetic config: vocab_size=64, emb_dim=32, hidden_dim=64 (!= emb_dim,
    # so use_fc_layer=True), max_len=16, batch=2, seq=8.
    B, S = 2, 8
    vocab_size, emb_dim, hidden_dim, max_len = 64, 32, 64, 16
    scale = math.sqrt(emb_dim)

    key = jax.random.PRNGKey(0)
    k_ids, k_emb, k_w, k_b = jax.random.split(key, 4)
    token_ids = jax.random.randint(k_ids, (B, S), 0, vocab_size, dtype=jnp.int32)
    emb_table = jax.random.normal(k_emb, (vocab_size, emb_dim), jnp.float32)
    w = jax.random.normal(k_w, (emb_dim, hidden_dim), jnp.float32) / math.sqrt(emb_dim)
    bias = jax.random.normal(k_b, (hidden_dim,), jnp.float32)
    pe = make_positional_encoding(max_len, emb_dim)

    out = embeddings_forward(token_ids, emb_table, pe, w, bias, scale=scale)
    out = jax.block_until_ready(out)

    # Float64 numpy reference of the PyTorch forward (dropout = identity).
    ids_np = np.asarray(token_ids)
    ref = ((np.asarray(emb_table, np.float64)[ids_np] * scale
            + np.asarray(pe, np.float64)[None, :S])
           @ np.asarray(w, np.float64)
           + np.asarray(bias, np.float64))

    assert out.shape == (B, S, hidden_dim)
    err = float(np.max(np.abs(np.asarray(out, np.float64) - ref)))
    # Tolerance covers f32 reassociation (folded scale / split pe term) and
    # multi-pass MXU f32 rounding; any logic error would be O(1).
    assert err < 1e-3, f"max abs error {err}"

    print("KERNEL_OK")
</pallas_src>

<mosaic_0001>
module attributes {stable_mosaic.version = 11 : i64} {
  func.func @_embeddings_kernel(%arg0: i32, %arg1: memref<128x1xi32, #tpu.memory_space<vmem>>, %arg2: memref<128x128xf32, #tpu.memory_space<vmem>>, %arg3: memref<128x128xf32, #tpu.memory_space<vmem>>, %arg4: memref<128x128xf32, #tpu.memory_space<vmem>>, %arg5: memref<128x128xf32, #tpu.memory_space<vmem>>) attributes {dimension_semantics = [#tpu.dimension_semantics<parallel>], iteration_bounds = array<i64: 1>, scalar_prefetch = 0 : i64, scratch_operands = 0 : i64, tpu.core_type = #tpu.core_type<tc>, window_params = [{transform_indices = @transform_0, window_bounds = array<i64: 128, 1>}, {pipeline_mode = #tpu.pipeline_mode<synchronous>, transform_indices = @transform_1, window_bounds = array<i64: 128, 128>}, {pipeline_mode = #tpu.pipeline_mode<synchronous>, transform_indices = @transform_2, window_bounds = array<i64: 128, 128>}, {transform_indices = @transform_3, window_bounds = array<i64: 128, 128>}, {transform_indices = @transform_4, window_bounds = array<i64: 128, 128>}]} {
    %c0 = arith.constant 0 : index
    %c0_0 = arith.constant 0 : index
    %0 = vector.load %arg1[%c0, %c0_0] : memref<128x1xi32, #tpu.memory_space<vmem>>, vector<128x1xi32>
    %1 = tpu.iota {dimensions = array<i32: 1>} : vector<128x128xi32>
    %2 = vector.broadcast %0 : vector<128x1xi32> to vector<128x128xi32>
    %3 = arith.cmpi eq, %1, %2 : vector<128x128xi32>
    %4 = arith.extui %3 : vector<128x128xi1> to vector<128x128xi32>
    %5 = arith.sitofp %4 : vector<128x128xi32> to vector<128x128xf32>
    %c0_1 = arith.constant 0 : index
    %c0_2 = arith.constant 0 : index
    %6 = vector.load %arg2[%c0_1, %c0_2] : memref<128x128xf32, #tpu.memory_space<vmem>>, vector<128x128xf32>
    %cst = arith.constant dense<0.000000e+00> : vector<128x128xf32>
    %7 = tpu.matmul %5, %6, %cst {dimension_numbers = #tpu.dot_dimension_numbers<[1], [0], [0], [1], [0, 0, 1, 1], [], []>} : vector<128x128xf32>, vector<128x128xf32>, vector<128x128xf32> -> vector<128x128xf32>
    %c0_3 = arith.constant 0 : index
    %c0_4 = arith.constant 0 : index
    %8 = vector.load %arg3[%c0_3, %c0_4] : memref<128x128xf32, #tpu.memory_space<vmem>>, vector<128x128xf32>
    %cst_5 = arith.constant dense<0.000000e+00> : vector<128x128xf32>
    %9 = tpu.matmul %7, %8, %cst_5 {dimension_numbers = #tpu.dot_dimension_numbers<[1], [0], [0], [1], [0, 0, 1, 1], [], []>} : vector<128x128xf32>, vector<128x128xf32>, vector<128x128xf32> -> vector<128x128xf32>
    %c0_6 = arith.constant 0 : index
    %c0_7 = arith.constant 0 : index
    %10 = vector.load %arg4[%c0_6, %c0_7] : memref<128x128xf32, #tpu.memory_space<vmem>>, vector<128x128xf32>
    %11 = arith.addf %9, %10 : vector<128x128xf32>
    %c0_8 = arith.constant 0 : index
    %c0_9 = arith.constant 0 : index
    %12 = vector.load %arg5[%c0_8, %c0_9] : memref<128x128xf32, #tpu.memory_space<vmem>>, vector<128x128xf32>
    tpu.vector_store %arg5[%c0_8, %c0_9], %11 {strides = array<i32>} : memref<128x128xf32, #tpu.memory_space<vmem>>, vector<128x128xf32>,
    return
  }
  func.func @transform_0(%arg0: i32) -> (i32, i32) {
    %c0_i32 = arith.constant 0 : i32
    %c0_i32_0 = arith.constant 0 : i32
    return %arg0, %c0_i32 : i32, i32
  }
  func.func @transform_1(%arg0: i32) -> (i32, i32) {
    %c0_i32 = arith.constant 0 : i32
    %c0_i32_0 = arith.constant 0 : i32
    %c0_i32_1 = arith.constant 0 : i32
    return %c0_i32, %c0_i32_0 : i32, i32
  }
  func.func @transform_2(%arg0: i32) -> (i32, i32) {
    %c0_i32 = arith.constant 0 : i32
    %c0_i32_0 = arith.constant 0 : i32
    %c0_i32_1 = arith.constant 0 : i32
    return %c0_i32, %c0_i32_0 : i32, i32
  }
  func.func @transform_3(%arg0: i32) -> (i32, i32) {
    %c0_i32 = arith.constant 0 : i32
    %c0_i32_0 = arith.constant 0 : i32
    return %arg0, %c0_i32 : i32, i32
  }
  func.func @transform_4(%arg0: i32) -> (i32, i32) {
    %c0_i32 = arith.constant 0 : i32
    %c0_i32_0 = arith.constant 0 : i32
    return %arg0, %c0_i32 : i32, i32
  }
}

module attributes {stable_mosaic.version = 11 : i64} {
  func.func @_embeddings_kernel(%arg0: i32, %arg1: memref<128x1xi32, #tpu.memory_space<vmem>>, %arg2: memref<128x128xf32, #tpu.memory_space<vmem>>, %arg3: memref<128x128xf32, #tpu.memory_space<vmem>>, %arg4: memref<128x128xf32, #tpu.memory_space<vmem>>, %arg5: memref<128x128xf32, #tpu.memory_space<vmem>>) attributes {dimension_semantics = [#tpu.dimension_semantics<parallel>], iteration_bounds = array<i64: 1>, scalar_prefetch = 0 : i64, scratch_operands = 0 : i64, tpu.core_type = #tpu.core_type<tc>, window_params = [{transform_indices = @transform_0, window_bounds = array<i64: 128, 1>}, {pipeline_mode = #tpu.pipeline_mode<synchronous>, transform_indices = @transform_1, window_bounds = array<i64: 128, 128>}, {pipeline_mode = #tpu.pipeline_mode<synchronous>, transform_indices = @transform_2, window_bounds = array<i64: 128, 128>}, {transform_indices = @transform_3, window_bounds = array<i64: 128, 128>}, {transform_indices = @transform_4, window_bounds = array<i64: 128, 128>}]} {
    %c0 = arith.constant 0 : index
    %c0_0 = arith.constant 0 : index
    %0 = vector.load %arg1[%c0, %c0_0] : memref<128x1xi32, #tpu.memory_space<vmem>>, vector<128x1xi32>
    %1 = tpu.iota {dimensions = array<i32: 1>} : vector<128x128xi32>
    %2 = vector.broadcast %0 : vector<128x1xi32> to vector<128x128xi32>
    %3 = arith.cmpi eq, %1, %2 : vector<128x128xi32>
    %4 = arith.extui %3 : vector<128x128xi1> to vector<128x128xi32>
    %5 = arith.sitofp %4 : vector<128x128xi32> to vector<128x128xf32>
    %c0_1 = arith.constant 0 : index
    %c0_2 = arith.constant 0 : index
    %6 = vector.load %arg2[%c0_1, %c0_2] : memref<128x128xf32, #tpu.memory_space<vmem>>, vector<128x128xf32>
    %cst = arith.constant dense<0.000000e+00> : vector<128x128xf32>
    %7 = tpu.matmul %5, %6, %cst {dimension_numbers = #tpu.dot_dimension_numbers<[1], [0], [0], [1], [0, 0, 1, 1], [], []>} : vector<128x128xf32>, vector<128x128xf32>, vector<128x128xf32> -> vector<128x128xf32>
    %c0_3 = arith.constant 0 : index
    %c0_4 = arith.constant 0 : index
    %8 = vector.load %arg3[%c0_3, %c0_4] : memref<128x128xf32, #tpu.memory_space<vmem>>, vector<128x128xf32>
    %cst_5 = arith.constant dense<0.000000e+00> : vector<128x128xf32>
    %9 = tpu.matmul %7, %8, %cst_5 {dimension_numbers = #tpu.dot_dimension_numbers<[1], [0], [0], [1], [0, 0, 1, 1], [], []>} : vector<128x128xf32>, vector<128x128xf32>, vector<128x128xf32> -> vector<128x128xf32>
    %c0_6 = arith.constant 0 : index
    %c0_7 = arith.constant 0 : index
    %10 = vector.load %arg4[%c0_6, %c0_7] : memref<128x128xf32, #tpu.memory_space<vmem>>, vector<128x128xf32>
    %11 = arith.addf %9, %10 : vector<128x128xf32>
    %c0_8 = arith.constant 0 : index
    %c0_9 = arith.constant 0 : index
    %12 = vector.load %arg5[%c0_8, %c0_9] : memref<128x128xf32, #tpu.memory_space<vmem>>, vector<128x128xf32>
    tpu.vector_store %arg5[%c0_8, %c0_9], %11 {strides = array<i32>} : memref<128x128xf32, #tpu.memory_space<vmem>>, vector<128x128xf32>,
    return
  }
  func.func @transform_0(%arg0: i32) -> (i32, i32) {
    %c0_i32 = arith.constant 0 : i32
    %c0_i32_0 = arith.constant 0 : i32
    return %arg0, %c0_i32 : i32, i32
  }
  func.func @transform_1(%arg0: i32) -> (i32, i32) {
    %c0_i32 = arith.constant 0 : i32
    %c0_i32_0 = arith.constant 0 : i32
    %c0_i32_1 = arith.constant 0 : i32
    return %c0_i32, %c0_i32_0 : i32, i32
  }
  func.func @transform_2(%arg0: i32) -> (i32, i32) {
    %c0_i32 = arith.constant 0 : i32
    %c0_i32_0 = arith.constant 0 : i32
    %c0_i32_1 = arith.constant 0 : i32
    return %c0_i32, %c0_i32_0 : i32, i32
  }
  func.func @transform_3(%arg0: i32) -> (i32, i32) {
    %c0_i32 = arith.constant 0 : i32
    %c0_i32_0 = arith.constant 0 : i32
    return %arg0, %c0_i32 : i32, i32
  }
  func.func @transform_4(%arg0: i32) -> (i32, i32) {
    %c0_i32 = arith.constant 0 : i32
    %c0_i32_0 = arith.constant 0 : i32
    return %arg0, %c0_i32 : i32, i32
  }
}

</mosaic_0001>

<bundles_post_ra>
// kernel: tpu_custom_call.1
= control target key start
LH: loop header
LB: loop body
LE: loop exit
PB: predicated region body
PF: predicated region fallthrough
CT: control target
= control target key end

     0   :  { %9 = vsyncpa [#allocation3], 0  ;;  %s710_s0 = inlined_call_operand.vmem [shape: s32[128,1], index: 0, kind: input, shape index: {}]   ;;  %s711_s1 = inlined_call_operand.vmem [shape: f32[128,128], index: 1, kind: input, shape index: {}]   ;;  %s712_s2 = inlined_call_operand.hbm [shape: f32[128,128], index: 2, kind: input, shape index: {}]   ;;  %s713_s3 = inlined_call_operand.hbm [shape: f32[128,128], index: 3, kind: input, shape index: {}]   ;;  %s714_s4 = inlined_call_operand.hbm [shape: f32[128,128], index: 4, kind: output, shape index: {}]  }
   0x1   :  { %10 = vsyncpa [#allocation6], 0 }
   0x2   :  { %11 = vsyncpa [#allocation4], 0  ;;  %s20_s17 = sshll.u32 %s712_s2, 4  ;;  %s530_s18 = smov [#allocation2]   ;;  %s21_s17 = int_to_ptr.hbm [resolvable:$true] %s20_s17 }
   0x3   :  { %s22_s19 = sshll.u32 %s530_s18, 4  ;;  %s33_s22 = sshll.u32 %s713_s3, 4  ;;  %s23_s19 = int_to_ptr.vmem [resolvable:$true] %s22_s19  ;;  %s34_s22 = int_to_ptr.hbm [resolvable:$true] %s33_s22 }
   0x4   :  { %s531_s23 = smov 128   ;;  %s532_s24 = smov 8  }
   0x5   :  { %28 = dma.hbm_to_vmem [thread:$0]  %s21_s17, 2048, %s23_s19, [#allocation3], %s531_s23, %s531_s23, %s532_s24  }
   0x6   :  { %s533_s25 = smov [#allocation5]  }
   0x7   :  { %s35_s26 = sshll.u32 %s533_s25, 4  ;;  %s36_s26 = int_to_ptr.vmem [resolvable:$true] %s35_s26 }
   0x8   :  { %41 = dma.hbm_to_vmem [thread:$0]  %s34_s22, 2048, %s36_s26, [#allocation6], %s531_s23, %s531_s23, %s532_s24  }
   0x9   :  { %524 = dma.done.wait [#allocation3], 2048  }
   0xa   :  { %525 = vsyncadd [#allocation3], 4294965248 }
   0xb   :  { %526 = dma.done.wait [#allocation6], 2048  }
   0xc   :  { %527 = vsyncadd [#allocation6], 4294965248  ;;  %v534_v0 = vmov 0   ;;  %v58_v1 = vld [vmem:[%s710_s0 + $0x40] sm:$0xff]  ;;  %v51_v3 = vld [vmem:[%s710_s0 + $0x8] sm:$0xff]  ;;  %v66_v33 = vlaneseq  ;;  %v535_v37 = vmov 1.0  }
   0xd   :  { %450 = vset.pattern.permute.xlu1 %v534_v0  ;;  %449 = vset.pattern.permute.xlu0 %v534_v0  ;;  %v50_v2 = vld [vmem:[%s710_s0] sm:$0xff]  ;;  %v59_v4 = vld [vmem:[%s710_s0 + $0x48] sm:$0xff]  ;;  %v60_v5 = vld [vmem:[%s710_s0 + $0x50] sm:$0xff]  ;;  %s364_s13 = sshll.u32 %s714_s4, 4  ;;  %s365_s13 = int_to_ptr.hbm [resolvable:$true] %s364_s13 }
   0xe   :  { %451 = vset.pattern.permute.xlu2 %v534_v0  ;;  %93 = vperm.xlu0 %449, %v58_v1   ;;  %v61_v6 = vld [vmem:[%s710_s0 + $0x58] sm:$0xff]  ;;  %v178_v8 = vld [vmem:[%s711_s1 + $0x70] sm:$0xff]  ;;  %v177_v9 = vld [vmem:[%s711_s1 + $0x68] sm:$0xff]  ;;  %v670_v34 = vand.u32 127, %v66_v33 }
   0xf   :  { %69 = vperm.xlu1 %450, %v50_v2   ;;  %72 = vperm.xlu2 %451, %v51_v3   ;;  %v179_v7 = vld [vmem:[%s711_s1 + $0x78] sm:$0xff]  ;;  %v176_v10 = vld [vmem:[%s711_s1 + $0x60] sm:$0xff]  ;;  %v52_v11 = vld [vmem:[%s710_s0 + $0x10] sm:$0xff] }
  0x10   :  { %180 = vmatpush.msra.mxu0 %v179_v7  ;;  %410 = vmatpush.msra.mxu2 %v179_v7  ;;  %v62_v12 = vld [vmem:[%s710_s0 + $0x60] sm:$0xff]  ;;  %v53_v13 = vld [vmem:[%s710_s0 + $0x18] sm:$0xff]  ;;  %v174_v15 = vld [vmem:[%s711_s1 + $0x50] sm:$0xff] }
  0x11   :  { %v175_v14 = vld [vmem:[%s711_s1 + $0x58] sm:$0xff]  ;;  %v173_v16 = vld [vmem:[%s711_s1 + $0x48] sm:$0xff]  ;;  %v54_v18 = vld [vmem:[%s710_s0 + $0x20] sm:$0xff] }
  0x12   :  { %181 = vmatpush.msra.mxu0 %v178_v8  ;;  %411 = vmatpush.msra.mxu2 %v178_v8  ;;  %v63_v17 = vld [vmem:[%s710_s0 + $0x68] sm:$0xff]  ;;  %v64_v19 = vld [vmem:[%s710_s0 + $0x70] sm:$0xff]  ;;  %v65_v21 = vld [vmem:[%s710_s0 + $0x78] sm:$0xff] }
  0x13   :  { %v55_v20 = vld [vmem:[%s710_s0 + $0x28] sm:$0xff]  ;;  %v56_v22 = vld [vmem:[%s710_s0 + $0x30] sm:$0xff]  ;;  %v57_v23 = vld [vmem:[%s710_s0 + $0x38] sm:$0xff] }
  0x14   :  { %182 = vmatpush.msra.mxu0 %v177_v9  ;;  %412 = vmatpush.msra.mxu2 %v177_v9  ;;  %v172_v24 = vld [vmem:[%s711_s1 + $0x40] sm:$0xff]  ;;  %v171_v25 = vld [vmem:[%s711_s1 + $0x38] sm:$0xff]  ;;  %v170_v26 = vld [vmem:[%s711_s1 + $0x30] sm:$0xff] }
  0x15   :  { %v169_v27 = vld [vmem:[%s711_s1 + $0x28] sm:$0xff]  ;;  %v168_v28 = vld [vmem:[%s711_s1 + $0x20] sm:$0xff]  ;;  %v167_v29 = vld [vmem:[%s711_s1 + $0x18] sm:$0xff] }
  0x16   :  { %96 = vperm.xlu0 %449, %v59_v4   ;;  %183 = vmatpush.msra.mxu0 %v176_v10  ;;  %v166_v30 = vld [vmem:[%s711_s1 + $0x10] sm:$0xff]  ;;  %v165_v31 = vld [vmem:[%s711_s1 + $0x8] sm:$0xff]  ;;  %v164_v32 = vld [vmem:[%s711_s1] sm:$0xff]  ;;  %s536_s1 = smov [#allocation7]  }
  0x17   :  { %99 = vperm.xlu1 %450, %v60_v5   ;;  %102 = vperm.xlu2 %451, %v61_v6   ;;  %v260_v45 = vld [vmem:[#allocation2 + $0x78] sm:$0xff]  ;;  %v259_v46 = vld [vmem:[#allocation2 + $0x70] sm:$0xff]  ;;  %v258_v48 = vld [vmem:[#allocation2 + $0x68] sm:$0xff]  ;;  %s362_s10 = sshll.u32 %s536_s1, 4  ;;  %s363_s10 = int_to_ptr.vmem [resolvable:$true] %s362_s10 }
  0x18   :  { %413 = vmatpush.msra.mxu2 %v176_v10  ;;  %184 = vmatpush.msra.mxu0 %v175_v14  ;;  %v257_v50 = vld [vmem:[#allocation2 + $0x60] sm:$0xff]  ;;  %v256_v51 = vld [vmem:[#allocation2 + $0x58] sm:$0xff]  ;;  %v255_v52 = vld [vmem:[#allocation2 + $0x50] sm:$0xff] }
  0x19   :  { %277 = vmatpush.msra.mxu1 %v260_v45  ;;  %426 = vmatpush.msra.mxu3 %v260_v45  ;;  %v254_v54 = vld [vmem:[#allocation2 + $0x48] sm:$0xff]  ;;  %v253_v56 = vld [vmem:[#allocation2 + $0x40] sm:$0xff]  ;;  %v252_v57 = vld [vmem:[#allocation2 + $0x38] sm:$0xff] }
  0x1a   :  { %414 = vmatpush.msra.mxu2 %v175_v14  ;;  %185 = vmatpush.msra.mxu0 %v174_v15  ;;  %v251_v58 = vld [vmem:[#allocation2 + $0x30] sm:$0xff]  ;;  %v250_v59 = vld [vmem:[#allocation2 + $0x28] sm:$0xff]  ;;  %v249_v61 = vld [vmem:[#allocation2 + $0x20] sm:$0xff] }
  0x1b   :  { %278 = vmatpush.msra.mxu1 %v259_v46  ;;  %427 = vmatpush.msra.mxu3 %v259_v46  ;;  %v248_v62 = vld [vmem:[#allocation2 + $0x18] sm:$0xff]  ;;  %v247_v63 = vld [vmem:[#allocation2 + $0x10] sm:$0xff]  ;;  %v246_v0 = vld [vmem:[#allocation2 + $0x8] sm:$0xff] }
  0x1c   :  { %415 = vmatpush.msra.mxu2 %v174_v15  ;;  %186 = vmatpush.msra.mxu0 %v173_v16  ;;  %v245_v3 = vld [vmem:[#allocation2] sm:$0xff] }
  0x1d   :  { %279 = vmatpush.msra.mxu1 %v258_v48  ;;  %428 = vmatpush.msra.mxu3 %v258_v48 }
  0x1e   :  { %75 = vperm.xlu0 %449, %v52_v11   ;;  %416 = vmatpush.msra.mxu2 %v173_v16 }
  0x1f   :  { %105 = vperm.xlu1 %450, %v62_v12   ;;  %78 = vperm.xlu2 %451, %v53_v13  }
  0x20   :  { %187 = vmatpush.msra.mxu0 %v172_v24  ;;  %417 = vmatpush.msra.mxu2 %v172_v24 }
  0x21   :  { %280 = vmatpush.msra.mxu1 %v257_v50  ;;  %429 = vmatpush.msra.mxu3 %v257_v50  ;;  %v273_v50 = vld [vmem:[#allocation5 + $0x60] sm:$0xff] }
  0x22   :  { %188 = vmatpush.msra.mxu0 %v171_v25  ;;  %418 = vmatpush.msra.mxu2 %v171_v25 }
  0x23   :  { %281 = vmatpush.msra.mxu1 %v256_v51  ;;  %430 = vmatpush.msra.mxu3 %v256_v51 }
  0x24   :  { %189 = vmatpush.msra.mxu0 %v170_v26  ;;  %419 = vmatpush.msra.mxu2 %v170_v26  ;;  %v269_v26 = vld [vmem:[#allocation5 + $0x40] sm:$0xff] }
  0x25   :  { %282 = vmatpush.msra.mxu1 %v255_v52  ;;  %431 = vmatpush.msra.mxu3 %v255_v52 }
  0x26   :  { %108 = vperm.xlu0 %449, %v63_v17   ;;  %190 = vmatpush.msra.mxu0 %v169_v27 }
  0x27   :  { %81 = vperm.xlu1 %450, %v54_v18   ;;  %111 = vperm.xlu2 %451, %v64_v19  }
  0x28   :  { %420 = vmatpush.msra.mxu2 %v169_v27  ;;  %191 = vmatpush.msra.mxu0 %v168_v28 }
  0x29   :  { %283 = vmatpush.msra.mxu1 %v254_v54  ;;  %432 = vmatpush.msra.mxu3 %v254_v54 }
  0x2a   :  { %421 = vmatpush.msra.mxu2 %v168_v28  ;;  %192 = vmatpush.msra.mxu0 %v167_v29 }
  0x2b   :  { %284 = vmatpush.msra.mxu1 %v253_v56  ;;  %433 = vmatpush.msra.mxu3 %v253_v56  ;;  %v274_v56 = vld [vmem:[#allocation5 + $0x68] sm:$0xff] }
  0x2c   :  { %422 = vmatpush.msra.mxu2 %v167_v29  ;;  %193 = vmatpush.msra.mxu0 %v166_v30  ;;  %v263_v29 = vld [vmem:[#allocation5 + $0x10] sm:$0xff] }
  0x2d   :  { %285 = vmatpush.msra.mxu1 %v252_v57  ;;  %434 = vmatpush.msra.mxu3 %v252_v57 }
  0x2e   :  { %84 = vperm.xlu0 %449, %v55_v20   ;;  %423 = vmatpush.msra.mxu2 %v166_v30  ;;  %v261_v20 = vld [vmem:[#allocation5] sm:$0xff] }
  0x2f   :  { %114 = vperm.xlu1 %450, %v65_v21   ;;  %87 = vperm.xlu2 %451, %v56_v22  }
  0x30   :  { %194 = vmatpush.msra.mxu0 %v165_v31  ;;  %424 = vmatpush.msra.mxu2 %v165_v31 }
  0x31   :  { %286 = vmatpush.msra.mxu1 %v251_v58  ;;  %435 = vmatpush.msra.mxu3 %v251_v58 }
  0x32   :  { %195 = vmatpush.msra.mxu0 %v164_v32  ;;  %425 = vmatpush.msra.mxu2 %v164_v32  ;;  %v270_v32 = vld [vmem:[#allocation5 + $0x48] sm:$0xff] }
  0x33   :  { %287 = vmatpush.msra.mxu1 %v250_v59  ;;  %436 = vmatpush.msra.mxu3 %v250_v59  ;;  %v268_v59 = vld [vmem:[#allocation5 + $0x38] sm:$0xff] }
  0x35   :  { %288 = vmatpush.msra.mxu1 %v249_v61  ;;  %437 = vmatpush.msra.mxu3 %v249_v61 }
  0x36   :  { %90 = vperm.xlu0 %449, %v57_v23   ;;  %v262_v23 = vld [vmem:[#allocation5 + $0x8] sm:$0xff] }
  0x37   :  { %289 = vmatpush.msra.mxu1 %v248_v62  ;;  %438 = vmatpush.msra.mxu3 %v248_v62  ;;  %v275_v62 = vld [vmem:[#allocation5 + $0x70] sm:$0xff] }
  0x39   :  { %290 = vmatpush.msra.mxu1 %v247_v63  ;;  %439 = vmatpush.msra.mxu3 %v247_v63 }
  0x3b   :  { %291 = vmatpush.msra.mxu1 %v246_v0  ;;  %440 = vmatpush.msra.mxu3 %v246_v0 }
  0x3d   :  { %292 = vmatpush.msra.mxu1 %v245_v3  ;;  %441 = vmatpush.msra.mxu3 %v245_v3 }
  0x69   :  { %v73_v38 = vpop.permute.xlu2 %72 }
  0x6a   :  { %vm117_vm2 = vcmp.eq.s32.totalorder %v670_v34, %v73_v38  ;;  %v271_v38 = vld [vmem:[#allocation5 + $0x50] sm:$0xff] }
  0x71   :  { %v103_v41 = vpop.permute.xlu2 %102 }
  0x72   :  { %vm127_vm6 = vcmp.eq.s32.totalorder %v670_v34, %v103_v41  ;;  %v265_v41 = vld [vmem:[#allocation5 + $0x20] sm:$0xff] }
  0x79   :  { %v79_v44 = vpop.permute.xlu2 %78 }
  0x7a   :  { %vm119_vm7 = vcmp.eq.s32.totalorder %v670_v34, %v79_v44  ;;  %v272_v44 = vld [vmem:[#allocation5 + $0x58] sm:$0xff] }
  0x80   :  { %v94_v35 = vpop.permute.xlu0 %93 }
  0x81   :  { %v70_v36 = vpop.permute.xlu1 %69  ;;  %vm124_vm0 = vcmp.eq.s32.totalorder %v670_v34, %v94_v35  ;;  %v112_v53 = vpop.permute.xlu2 %111  ;;  %v264_v35 = vld [vmem:[#allocation5 + $0x18] sm:$0xff] }
  0x82   :  { %vm116_vm1 = vcmp.eq.s32.totalorder %v670_v34, %v70_v36  ;;  %402 = vmatmul.msk.f32.vlgmr.msra.gmra.mxu2 %vm124_vm0, %v535_v37  ;;  %vm130_vm12 = vcmp.eq.s32.totalorder %v670_v34, %v112_v53  ;;  %v267_v53 = vld [vmem:[#allocation5 + $0x30] sm:$0xff] }
  0x83   :  { %394 = vmatmul.msk.f32.vlgmr.msra.gmra.mxu0 %vm116_vm1, %v535_v37 }
  0x88   :  { %v97_v39 = vpop.permute.xlu0 %96 }
  0x89   :  { %vm125_vm3 = vcmp.eq.s32.totalorder %v670_v34, %v97_v39  ;;  %v100_v40 = vpop.permute.xlu1 %99  ;;  %v88_v60 = vpop.permute.xlu2 %87 }
  0x8a   :  { %403 = vmatmul.msk.f32.gmra.mxu2 %vm125_vm3, %v535_v37  ;;  %vm126_vm4 = vcmp.eq.s32.totalorder %v670_v34, %v100_v40  ;;  %vm122_vm13 = vcmp.eq.s32.totalorder %v670_v34, %v88_v60 }
  0x8b   :  { %395 = vmatmul.msk.f32.gmra.mxu0 %vm117_vm2, %v535_v37 }
  0x90   :  { %v76_v42 = vpop.permute.xlu0 %75 }
  0x91   :  { %vm118_vm5 = vcmp.eq.s32.totalorder %v670_v34, %v76_v42  ;;  %v106_v43 = vpop.permute.xlu1 %105 }
  0x92   :  { %404 = vmatmul.msk.f32.gmra.mxu2 %vm126_vm4, %v535_v37  ;;  %vm128_vm8 = vcmp.eq.s32.totalorder %v670_v34, %v106_v43 }
  0x93   :  { %396 = vmatmul.msk.f32.gmra.mxu0 %vm118_vm5, %v535_v37 }
  0x98   :  { %v109_v47 = vpop.permute.xlu0 %108 }
  0x99   :  { %v82_v49 = vpop.permute.xlu1 %81  ;;  %vm129_vm10 = vcmp.eq.s32.totalorder %v670_v34, %v109_v47  ;;  %v266_v47 = vld [vmem:[#allocation5 + $0x28] sm:$0xff] }
  0x9a   :  { %405 = vmatmul.msk.f32.gmra.mxu2 %vm127_vm6, %v535_v37  ;;  %vm120_vm9 = vcmp.eq.s32.totalorder %v670_v34, %v82_v49 }
  0x9b   :  { %397 = vmatmul.msk.f32.gmra.mxu0 %vm119_vm7, %v535_v37 }
  0xa0   :  { %v85_v55 = vpop.permute.xlu0 %84 }
  0xa1   :  { %vm121_vm11 = vcmp.eq.s32.totalorder %v670_v34, %v85_v55  ;;  %v115_v1 = vpop.permute.xlu1 %114 }
  0xa2   :  { %406 = vmatmul.msk.f32.gmra.mxu2 %vm128_vm8, %v535_v37  ;;  %vm131_vm14 = vcmp.eq.s32.totalorder %v670_v34, %v115_v1  ;;  %v276_v1 = vld [vmem:[#allocation5 + $0x78] sm:$0xff] }
  0xa3   :  { %398 = vmatmul.msk.f32.gmra.mxu0 %vm120_vm9, %v535_v37 }
  0xa8   :  { %v91_v2 = vpop.permute.xlu0 %90 }
  0xa9   :  { %vm123_vm15 = vcmp.eq.s32.totalorder %v670_v34, %v91_v2 }
  0xaa   :  { %407 = vmatmul.msk.f32.gmra.mxu2 %vm129_vm10, %v535_v37 }
  0xab   :  { %399 = vmatmul.msk.f32.gmra.mxu0 %vm121_vm11, %v535_v37 }
  0xb2   :  { %408 = vmatmul.msk.f32.gmra.mxu2 %vm130_vm12, %v535_v37 }
  0xb3   :  { %400 = vmatmul.msk.f32.gmra.mxu0 %vm122_vm13, %v535_v37 }
  0xba   :  { %409 = vmatmul.msk.f32.gmra.mxu2 %vm131_vm14, %v535_v37 }
  0xbb   :  { %401 = vmatmul.msk.f32.gmra.mxu0 %vm123_vm15, %v535_v37 }
 0x100   :  { %v197_v4 = vpop.f32.mrf.mxu0 }
 0x101   :  { %293 = vmatmul.f32.vlgmr.msra.gmra.mxu1 %v197_v4 }
 0x105   :  { %v221_v5 = vpop.f32.mrf.mxu2 }
 0x106   :  { %317 = vmatmul.f32.vlgmr.msra.gmra.mxu3 %v221_v5 }
 0x108   :  { %v200_v6 = vpop.f32.mrf.mxu0 }
 0x109   :  { %296 = vmatmul.f32.gmra.mxu1 %v200_v6 }
 0x10d   :  { %v224_v7 = vpop.f32.mrf.mxu2 }
 0x10e   :  { %320 = vmatmul.f32.gmra.mxu3 %v224_v7 }
 0x110   :  { %v203_v8 = vpop.f32.mrf.mxu0 }
 0x111   :  { %299 = vmatmul.f32.gmra.mxu1 %v203_v8 }
 0x115   :  { %v227_v9 = vpop.f32.mrf.mxu2 }
 0x116   :  { %323 = vmatmul.f32.gmra.mxu3 %v227_v9 }
 0x118   :  { %v206_v10 = vpop.f32.mrf.mxu0 }
 0x119   :  { %302 = vmatmul.f32.gmra.mxu1 %v206_v10 }
 0x11d   :  { %v230_v11 = vpop.f32.mrf.mxu2 }
 0x11e   :  { %326 = vmatmul.f32.gmra.mxu3 %v230_v11 }
 0x120   :  { %v209_v12 = vpop.f32.mrf.mxu0 }
 0x121   :  { %305 = vmatmul.f32.gmra.mxu1 %v209_v12 }
 0x125   :  { %v233_v13 = vpop.f32.mrf.mxu2 }
 0x126   :  { %329 = vmatmul.f32.gmra.mxu3 %v233_v13 }
 0x128   :  { %v212_v14 = vpop.f32.mrf.mxu0 }
 0x129   :  { %308 = vmatmul.f32.gmra.mxu1 %v212_v14 }
 0x12d   :  { %v236_v15 = vpop.f32.mrf.mxu2 }
 0x12e   :  { %332 = vmatmul.f32.gmra.mxu3 %v236_v15 }
 0x130   :  { %v215_v16 = vpop.f32.mrf.mxu0 }
 0x131   :  { %311 = vmatmul.f32.gmra.mxu1 %v215_v16 }
 0x135   :  { %v239_v17 = vpop.f32.mrf.mxu2 }
 0x136   :  { %335 = vmatmul.f32.gmra.mxu3 %v239_v17 }
 0x138   :  { %v218_v18 = vpop.f32.mrf.mxu0 }
 0x139   :  { %314 = vmatmul.f32.gmra.mxu1 %v218_v18 }
 0x13d   :  { %v242_v19 = vpop.f32.mrf.mxu2 }
 0x13e   :  { %338 = vmatmul.f32.gmra.mxu3 %v242_v19 }
 0x17e   :  { %v294_v21 = vpop.f32.mrf.mxu1 }
 0x17f   :  { %v295_v22 = vadd.f32 %v294_v21, %v261_v20 }
 0x181   :  { %342 = vst [vmem:[#allocation7] sm:$0xff] %v295_v22 }
 0x186   :  { %v297_v24 = vpop.f32.mrf.mxu1 }
 0x187   :  { %v298_v25 = vadd.f32 %v297_v24, %v262_v23 }
 0x189   :  { %343 = vst [vmem:[#allocation7 + $0x8] sm:$0xff] %v298_v25  ;;  %v318_v27 = vpop.f32.mrf.mxu3 }
 0x18a   :  { %v319_v28 = vadd.f32 %v318_v27, %v269_v26 }
 0x18c   :  { %350 = vst [vmem:[#allocation7 + $0x40] sm:$0xff] %v319_v28 }
 0x18e   :  { %v300_v30 = vpop.f32.mrf.mxu1 }
 0x18f   :  { %v301_v31 = vadd.f32 %v300_v30, %v263_v29 }
 0x191   :  { %344 = vst [vmem:[#allocation7 + $0x10] sm:$0xff] %v301_v31  ;;  %v321_v33 = vpop.f32.mrf.mxu3 }
 0x192   :  { %v322_v34 = vadd.f32 %v321_v33, %v270_v32 }
 0x194   :  { %351 = vst [vmem:[#allocation7 + $0x48] sm:$0xff] %v322_v34 }
 0x196   :  { %v303_v36 = vpop.f32.mrf.mxu1 }
 0x197   :  { %v304_v37 = vadd.f32 %v303_v36, %v264_v35 }
 0x199   :  { %345 = vst [vmem:[#allocation7 + $0x18] sm:$0xff] %v304_v37  ;;  %v324_v39 = vpop.f32.mrf.mxu3 }
 0x19a   :  { %v325_v40 = vadd.f32 %v324_v39, %v271_v38 }
 0x19c   :  { %352 = vst [vmem:[#allocation7 + $0x50] sm:$0xff] %v325_v40 }
 0x19e   :  { %v306_v42 = vpop.f32.mrf.mxu1 }
 0x19f   :  { %v307_v43 = vadd.f32 %v306_v42, %v265_v41 }
 0x1a1   :  { %346 = vst [vmem:[#allocation7 + $0x20] sm:$0xff] %v307_v43  ;;  %v327_v45 = vpop.f32.mrf.mxu3 }
 0x1a2   :  { %v328_v46 = vadd.f32 %v327_v45, %v272_v44 }
 0x1a4   :  { %353 = vst [vmem:[#allocation7 + $0x58] sm:$0xff] %v328_v46 }
 0x1a6   :  { %v309_v48 = vpop.f32.mrf.mxu1 }
 0x1a7   :  { %v310_v49 = vadd.f32 %v309_v48, %v266_v47 }
 0x1a9   :  { %347 = vst [vmem:[#allocation7 + $0x28] sm:$0xff] %v310_v49  ;;  %v330_v51 = vpop.f32.mrf.mxu3 }
 0x1aa   :  { %v331_v52 = vadd.f32 %v330_v51, %v273_v50 }
 0x1ac   :  { %354 = vst [vmem:[#allocation7 + $0x60] sm:$0xff] %v331_v52 }
 0x1ae   :  { %v312_v54 = vpop.f32.mrf.mxu1 }
 0x1af   :  { %v313_v55 = vadd.f32 %v312_v54, %v267_v53 }
 0x1b1   :  { %348 = vst [vmem:[#allocation7 + $0x30] sm:$0xff] %v313_v55  ;;  %v333_v57 = vpop.f32.mrf.mxu3 }
 0x1b2   :  { %v334_v58 = vadd.f32 %v333_v57, %v274_v56 }
 0x1b4   :  { %355 = vst [vmem:[#allocation7 + $0x68] sm:$0xff] %v334_v58 }
 0x1b6   :  { %v315_v60 = vpop.f32.mrf.mxu1 }
 0x1b7   :  { %v316_v61 = vadd.f32 %v315_v60, %v268_v59 }
 0x1b9   :  { %349 = vst [vmem:[#allocation7 + $0x38] sm:$0xff] %v316_v61  ;;  %v336_v63 = vpop.f32.mrf.mxu3 }
 0x1ba   :  { %v337_v0 = vadd.f32 %v336_v63, %v275_v62 }
 0x1bc   :  { %356 = vst [vmem:[#allocation7 + $0x70] sm:$0xff] %v337_v0 }
 0x1c1   :  { %v339_v2 = vpop.f32.mrf.mxu3 }
 0x1c2   :  { %v340_v3 = vadd.f32 %v339_v2, %v276_v1 }
 0x1c4   :  { %357 = vst [vmem:[#allocation7 + $0x78] sm:$0xff] %v340_v3 }
 0x1c5   :  { %370 = dma.vmem_to_hbm [thread:$0]  %s363_s10, 2048, %s365_s13, [#allocation4], %s531_s23, %s531_s23, %s532_s24  }
 0x1c6   :  { %528 = dma.done.wait [#allocation4], 2048  }
 0x1c7   :  { %529 = vsyncadd [#allocation4], 4294965248 }
 0x1c8   :  { %375 = vsyncpa [#allocation3], 1 }
 0x1c9   :  { %376 = vsyncpa [#allocation6], 1 }
 0x1ca   :  { %377 = vsyncpa [#allocation4], 1 }

// kernel: tpu_custom_call.1
= control target key start
LH: loop header
LB: loop body
LE: loop exit
PB: predicated region body
PF: predicated region fallthrough
CT: control target
= control target key end

     0   :  { %9 = vsyncpa [#allocation3], 0  ;;  %s710_s0 = inlined_call_operand.vmem [shape: s32[128,1], index: 0, kind: input, shape index: {}]   ;;  %s711_s1 = inlined_call_operand.vmem [shape: f32[128,128], index: 1, kind: input, shape index: {}]   ;;  %s712_s2 = inlined_call_operand.hbm [shape: f32[128,128], index: 2, kind: input, shape index: {}]   ;;  %s713_s3 = inlined_call_operand.hbm [shape: f32[128,128], index: 3, kind: input, shape index: {}]   ;;  %s714_s4 = inlined_call_operand.hbm [shape: f32[128,128], index: 4, kind: output, shape index: {}]  }
   0x1   :  { %10 = vsyncpa [#allocation6], 0 }
   0x2   :  { %11 = vsyncpa [#allocation4], 0  ;;  %s20_s17 = sshll.u32 %s712_s2, 4  ;;  %s530_s18 = smov [#allocation2]   ;;  %s21_s17 = int_to_ptr.hbm [resolvable:$true] %s20_s17 }
   0x3   :  { %s22_s19 = sshll.u32 %s530_s18, 4  ;;  %s33_s22 = sshll.u32 %s713_s3, 4  ;;  %s23_s19 = int_to_ptr.vmem [resolvable:$true] %s22_s19  ;;  %s34_s22 = int_to_ptr.hbm [resolvable:$true] %s33_s22 }
   0x4   :  { %s531_s23 = smov 128   ;;  %s532_s24 = smov 8  }
   0x5   :  { %28 = dma.hbm_to_vmem [thread:$0]  %s21_s17, 2048, %s23_s19, [#allocation3], %s531_s23, %s531_s23, %s532_s24  }
   0x6   :  { %s533_s25 = smov [#allocation5]  }
   0x7   :  { %s35_s26 = sshll.u32 %s533_s25, 4  ;;  %s36_s26 = int_to_ptr.vmem [resolvable:$true] %s35_s26 }
   0x8   :  { %41 = dma.hbm_to_vmem [thread:$0]  %s34_s22, 2048, %s36_s26, [#allocation6], %s531_s23, %s531_s23, %s532_s24  }
   0x9   :  { %524 = dma.done.wait [#allocation3], 2048  }
   0xa   :  { %525 = vsyncadd [#allocation3], 4294965248 }
   0xb   :  { %526 = dma.done.wait [#allocation6], 2048  }
   0xc   :  { %527 = vsyncadd [#allocation6], 4294965248  ;;  %v534_v0 = vmov 0   ;;  %v58_v1 = vld [vmem:[%s710_s0 + $0x40] sm:$0xff]  ;;  %v51_v3 = vld [vmem:[%s710_s0 + $0x8] sm:$0xff]  ;;  %v66_v33 = vlaneseq  ;;  %v535_v37 = vmov 1.0  }
   0xd   :  { %450 = vset.pattern.permute.xlu1 %v534_v0  ;;  %449 = vset.pattern.permute.xlu0 %v534_v0  ;;  %v50_v2 = vld [vmem:[%s710_s0] sm:$0xff]  ;;  %v59_v4 = vld [vmem:[%s710_s0 + $0x48] sm:$0xff]  ;;  %v60_v5 = vld [vmem:[%s710_s0 + $0x50] sm:$0xff]  ;;  %s364_s13 = sshll.u32 %s714_s4, 4  ;;  %s365_s13 = int_to_ptr.hbm [resolvable:$true] %s364_s13 }
   0xe   :  { %451 = vset.pattern.permute.xlu2 %v534_v0  ;;  %93 = vperm.xlu0 %449, %v58_v1   ;;  %v61_v6 = vld [vmem:[%s710_s0 + $0x58] sm:$0xff]  ;;  %v178_v8 = vld [vmem:[%s711_s1 + $0x70] sm:$0xff]  ;;  %v177_v9 = vld [vmem:[%s711_s1 + $0x68] sm:$0xff]  ;;  %v670_v34 = vand.u32 127, %v66_v33 }
   0xf   :  { %69 = vperm.xlu1 %450, %v50_v2   ;;  %72 = vperm.xlu2 %451, %v51_v3   ;;  %v179_v7 = vld [vmem:[%s711_s1 + $0x78] sm:$0xff]  ;;  %v176_v10 = vld [vmem:[%s711_s1 + $0x60] sm:$0xff]  ;;  %v52_v11 = vld [vmem:[%s710_s0 + $0x10] sm:$0xff] }
  0x10   :  { %180 = vmatpush.msra.mxu0 %v179_v7  ;;  %410 = vmatpush.msra.mxu2 %v179_v7  ;;  %v62_v12 = vld [vmem:[%s710_s0 + $0x60] sm:$0xff]  ;;  %v53_v13 = vld [vmem:[%s710_s0 + $0x18] sm:$0xff]  ;;  %v174_v15 = vld [vmem:[%s711_s1 + $0x50] sm:$0xff] }
  0x11   :  { %v175_v14 = vld [vmem:[%s711_s1 + $0x58] sm:$0xff]  ;;  %v173_v16 = vld [vmem:[%s711_s1 + $0x48] sm:$0xff]  ;;  %v54_v18 = vld [vmem:[%s710_s0 + $0x20] sm:$0xff] }
  0x12   :  { %181 = vmatpush.msra.mxu0 %v178_v8  ;;  %411 = vmatpush.msra.mxu2 %v178_v8  ;;  %v63_v17 = vld [vmem:[%s710_s0 + $0x68] sm:$0xff]  ;;  %v64_v19 = vld [vmem:[%s710_s0 + $0x70] sm:$0xff]  ;;  %v65_v21 = vld [vmem:[%s710_s0 + $0x78] sm:$0xff] }
  0x13   :  { %v55_v20 = vld [vmem:[%s710_s0 + $0x28] sm:$0xff]  ;;  %v56_v22 = vld [vmem:[%s710_s0 + $0x30] sm:$0xff]  ;;  %v57_v23 = vld [vmem:[%s710_s0 + $0x38] sm:$0xff] }
  0x14   :  { %182 = vmatpush.msra.mxu0 %v177_v9  ;;  %412 = vmatpush.msra.mxu2 %v177_v9  ;;  %v172_v24 = vld [vmem:[%s711_s1 + $0x40] sm:$0xff]  ;;  %v171_v25 = vld [vmem:[%s711_s1 + $0x38] sm:$0xff]  ;;  %v170_v26 = vld [vmem:[%s711_s1 + $0x30] sm:$0xff] }
  0x15   :  { %v169_v27 = vld [vmem:[%s711_s1 + $0x28] sm:$0xff]  ;;  %v168_v28 = vld [vmem:[%s711_s1 + $0x20] sm:$0xff]  ;;  %v167_v29 = vld [vmem:[%s711_s1 + $0x18] sm:$0xff] }
  0x16   :  { %96 = vperm.xlu0 %449, %v59_v4   ;;  %183 = vmatpush.msra.mxu0 %v176_v10  ;;  %v166_v30 = vld [vmem:[%s711_s1 + $0x10] sm:$0xff]  ;;  %v165_v31 = vld [vmem:[%s711_s1 + $0x8] sm:$0xff]  ;;  %v164_v32 = vld [vmem:[%s711_s1] sm:$0xff]  ;;  %s536_s1 = smov [#allocation7]  }
  0x17   :  { %99 = vperm.xlu1 %450, %v60_v5   ;;  %102 = vperm.xlu2 %451, %v61_v6   ;;  %v260_v45 = vld [vmem:[#allocation2 + $0x78] sm:$0xff]  ;;  %v259_v46 = vld [vmem:[#allocation2 + $0x70] sm:$0xff]  ;;  %v258_v48 = vld [vmem:[#allocation2 + $0x68] sm:$0xff]  ;;  %s362_s10 = sshll.u32 %s536_s1, 4  ;;  %s363_s10 = int_to_ptr.vmem [resolvable:$true] %s362_s10 }
  0x18   :  { %413 = vmatpush.msra.mxu2 %v176_v10  ;;  %184 = vmatpush.msra.mxu0 %v175_v14  ;;  %v257_v50 = vld [vmem:[#allocation2 + $0x60] sm:$0xff]  ;;  %v256_v51 = vld [vmem:[#allocation2 + $0x58] sm:$0xff]  ;;  %v255_v52 = vld [vmem:[#allocation2 + $0x50] sm:$0xff] }
  0x19   :  { %277 = vmatpush.msra.mxu1 %v260_v45  ;;  %426 = vmatpush.msra.mxu3 %v260_v45  ;;  %v254_v54 = vld [vmem:[#allocation2 + $0x48] sm:$0xff]  ;;  %v253_v56 = vld [vmem:[#allocation2 + $0x40] sm:$0xff]  ;;  %v252_v57 = vld [vmem:[#allocation2 + $0x38] sm:$0xff] }
  0x1a   :  { %414 = vmatpush.msra.mxu2 %v175_v14  ;;  %185 = vmatpush.msra.mxu0 %v174_v15  ;;  %v251_v58 = vld [vmem:[#allocation2 + $0x30] sm:$0xff]  ;;  %v250_v59 = vld [vmem:[#allocation2 + $0x28] sm:$0xff]  ;;  %v249_v61 = vld [vmem:[#allocation2 + $0x20] sm:$0xff] }
  0x1b   :  { %278 = vmatpush.msra.mxu1 %v259_v46  ;;  %427 = vmatpush.msra.mxu3 %v259_v46  ;;  %v248_v62 = vld [vmem:[#allocation2 + $0x18] sm:$0xff]  ;;  %v247_v63 = vld [vmem:[#allocation2 + $0x10] sm:$0xff]  ;;  %v246_v0 = vld [vmem:[#allocation2 + $0x8] sm:$0xff] }
  0x1c   :  { %415 = vmatpush.msra.mxu2 %v174_v15  ;;  %186 = vmatpush.msra.mxu0 %v173_v16  ;;  %v245_v3 = vld [vmem:[#allocation2] sm:$0xff] }
  0x1d   :  { %279 = vmatpush.msra.mxu1 %v258_v48  ;;  %428 = vmatpush.msra.mxu3 %v258_v48 }
  0x1e   :  { %75 = vperm.xlu0 %449, %v52_v11   ;;  %416 = vmatpush.msra.mxu2 %v173_v16 }
  0x1f   :  { %105 = vperm.xlu1 %450, %v62_v12   ;;  %78 = vperm.xlu2 %451, %v53_v13  }
  0x20   :  { %187 = vmatpush.msra.mxu0 %v172_v24  ;;  %417 = vmatpush.msra.mxu2 %v172_v24 }
  0x21   :  { %280 = vmatpush.msra.mxu1 %v257_v50  ;;  %429 = vmatpush.msra.mxu3 %v257_v50  ;;  %v273_v50 = vld [vmem:[#allocation5 + $0x60] sm:$0xff] }
  0x22   :  { %188 = vmatpush.msra.mxu0 %v171_v25  ;;  %418 = vmatpush.msra.mxu2 %v171_v25 }
  0x23   :  { %281 = vmatpush.msra.mxu1 %v256_v51  ;;  %430 = vmatpush.msra.mxu3 %v256_v51 }
  0x24   :  { %189 = vmatpush.msra.mxu0 %v170_v26  ;;  %419 = vmatpush.msra.mxu2 %v170_v26  ;;  %v269_v26 = vld [vmem:[#allocation5 + $0x40] sm:$0xff] }
  0x25   :  { %282 = vmatpush.msra.mxu1 %v255_v52  ;;  %431 = vmatpush.msra.mxu3 %v255_v52 }
  0x26   :  { %108 = vperm.xlu0 %449, %v63_v17   ;;  %190 = vmatpush.msra.mxu0 %v169_v27 }
  0x27   :  { %81 = vperm.xlu1 %450, %v54_v18   ;;  %111 = vperm.xlu2 %451, %v64_v19  }
  0x28   :  { %420 = vmatpush.msra.mxu2 %v169_v27  ;;  %191 = vmatpush.msra.mxu0 %v168_v28 }
  0x29   :  { %283 = vmatpush.msra.mxu1 %v254_v54  ;;  %432 = vmatpush.msra.mxu3 %v254_v54 }
  0x2a   :  { %421 = vmatpush.msra.mxu2 %v168_v28  ;;  %192 = vmatpush.msra.mxu0 %v167_v29 }
  0x2b   :  { %284 = vmatpush.msra.mxu1 %v253_v56  ;;  %433 = vmatpush.msra.mxu3 %v253_v56  ;;  %v274_v56 = vld [vmem:[#allocation5 + $0x68] sm:$0xff] }
  0x2c   :  { %422 = vmatpush.msra.mxu2 %v167_v29  ;;  %193 = vmatpush.msra.mxu0 %v166_v30  ;;  %v263_v29 = vld [vmem:[#allocation5 + $0x10] sm:$0xff] }
  0x2d   :  { %285 = vmatpush.msra.mxu1 %v252_v57  ;;  %434 = vmatpush.msra.mxu3 %v252_v57 }
  0x2e   :  { %84 = vperm.xlu0 %449, %v55_v20   ;;  %423 = vmatpush.msra.mxu2 %v166_v30  ;;  %v261_v20 = vld [vmem:[#allocation5] sm:$0xff] }
  0x2f   :  { %114 = vperm.xlu1 %450, %v65_v21   ;;  %87 = vperm.xlu2 %451, %v56_v22  }
  0x30   :  { %194 = vmatpush.msra.mxu0 %v165_v31  ;;  %424 = vmatpush.msra.mxu2 %v165_v31 }
  0x31   :  { %286 = vmatpush.msra.mxu1 %v251_v58  ;;  %435 = vmatpush.msra.mxu3 %v251_v58 }
  0x32   :  { %195 = vmatpush.msra.mxu0 %v164_v32  ;;  %425 = vmatpush.msra.mxu2 %v164_v32  ;;  %v270_v32 = vld [vmem:[#allocation5 + $0x48] sm:$0xff] }
  0x33   :  { %287 = vmatpush.msra.mxu1 %v250_v59  ;;  %436 = vmatpush.msra.mxu3 %v250_v59  ;;  %v268_v59 = vld [vmem:[#allocation5 + $0x38] sm:$0xff] }
  0x35   :  { %288 = vmatpush.msra.mxu1 %v249_v61  ;;  %437 = vmatpush.msra.mxu3 %v249_v61 }
  0x36   :  { %90 = vperm.xlu0 %449, %v57_v23   ;;  %v262_v23 = vld [vmem:[#allocation5 + $0x8] sm:$0xff] }
  0x37   :  { %289 = vmatpush.msra.mxu1 %v248_v62  ;;  %438 = vmatpush.msra.mxu3 %v248_v62  ;;  %v275_v62 = vld [vmem:[#allocation5 + $0x70] sm:$0xff] }
  0x39   :  { %290 = vmatpush.msra.mxu1 %v247_v63  ;;  %439 = vmatpush.msra.mxu3 %v247_v63 }
  0x3b   :  { %291 = vmatpush.msra.mxu1 %v246_v0  ;;  %440 = vmatpush.msra.mxu3 %v246_v0 }
  0x3d   :  { %292 = vmatpush.msra.mxu1 %v245_v3  ;;  %441 = vmatpush.msra.mxu3 %v245_v3 }
  0x69   :  { %v73_v38 = vpop.permute.xlu2 %72 }
  0x6a   :  { %vm117_vm2 = vcmp.eq.s32.totalorder %v670_v34, %v73_v38  ;;  %v271_v38 = vld [vmem:[#allocation5 + $0x50] sm:$0xff] }
  0x71   :  { %v103_v41 = vpop.permute.xlu2 %102 }
  0x72   :  { %vm127_vm6 = vcmp.eq.s32.totalorder %v670_v34, %v103_v41  ;;  %v265_v41 = vld [vmem:[#allocation5 + $0x20] sm:$0xff] }
  0x79   :  { %v79_v44 = vpop.permute.xlu2 %78 }
  0x7a   :  { %vm119_vm7 = vcmp.eq.s32.totalorder %v670_v34, %v79_v44  ;;  %v272_v44 = vld [vmem:[#allocation5 + $0x58] sm:$0xff] }
  0x80   :  { %v94_v35 = vpop.permute.xlu0 %93 }
  0x81   :  { %v70_v36 = vpop.permute.xlu1 %69  ;;  %vm124_vm0 = vcmp.eq.s32.totalorder %v670_v34, %v94_v35  ;;  %v112_v53 = vpop.permute.xlu2 %111  ;;  %v264_v35 = vld [vmem:[#allocation5 + $0x18] sm:$0xff] }
  0x82   :  { %vm116_vm1 = vcmp.eq.s32.totalorder %v670_v34, %v70_v36  ;;  %402 = vmatmul.msk.f32.vlgmr.msra.gmra.mxu2 %vm124_vm0, %v535_v37  ;;  %vm130_vm12 = vcmp.eq.s32.totalorder %v670_v34, %v112_v53  ;;  %v267_v53 = vld [vmem:[#allocation5 + $0x30] sm:$0xff] }
  0x83   :  { %394 = vmatmul.msk.f32.vlgmr.msra.gmra.mxu0 %vm116_vm1, %v535_v37 }
  0x88   :  { %v97_v39 = vpop.permute.xlu0 %96 }
  0x89   :  { %vm125_vm3 = vcmp.eq.s32.totalorder %v670_v34, %v97_v39  ;;  %v100_v40 = vpop.permute.xlu1 %99  ;;  %v88_v60 = vpop.permute.xlu2 %87 }
  0x8a   :  { %403 = vmatmul.msk.f32.gmra.mxu2 %vm125_vm3, %v535_v37  ;;  %vm126_vm4 = vcmp.eq.s32.totalorder %v670_v34, %v100_v40  ;;  %vm122_vm13 = vcmp.eq.s32.totalorder %v670_v34, %v88_v60 }
  0x8b   :  { %395 = vmatmul.msk.f32.gmra.mxu0 %vm117_vm2, %v535_v37 }
  0x90   :  { %v76_v42 = vpop.permute.xlu0 %75 }
  0x91   :  { %vm118_vm5 = vcmp.eq.s32.totalorder %v670_v34, %v76_v42  ;;  %v106_v43 = vpop.permute.xlu1 %105 }
  0x92   :  { %404 = vmatmul.msk.f32.gmra.mxu2 %vm126_vm4, %v535_v37  ;;  %vm128_vm8 = vcmp.eq.s32.totalorder %v670_v34, %v106_v43 }
  0x93   :  { %396 = vmatmul.msk.f32.gmra.mxu0 %vm118_vm5, %v535_v37 }
  0x98   :  { %v109_v47 = vpop.permute.xlu0 %108 }
  0x99   :  { %v82_v49 = vpop.permute.xlu1 %81  ;;  %vm129_vm10 = vcmp.eq.s32.totalorder %v670_v34, %v109_v47  ;;  %v266_v47 = vld [vmem:[#allocation5 + $0x28] sm:$0xff] }
  0x9a   :  { %405 = vmatmul.msk.f32.gmra.mxu2 %vm127_vm6, %v535_v37  ;;  %vm120_vm9 = vcmp.eq.s32.totalorder %v670_v34, %v82_v49 }
  0x9b   :  { %397 = vmatmul.msk.f32.gmra.mxu0 %vm119_vm7, %v535_v37 }
  0xa0   :  { %v85_v55 = vpop.permute.xlu0 %84 }
  0xa1   :  { %vm121_vm11 = vcmp.eq.s32.totalorder %v670_v34, %v85_v55  ;;  %v115_v1 = vpop.permute.xlu1 %114 }
  0xa2   :  { %406 = vmatmul.msk.f32.gmra.mxu2 %vm128_vm8, %v535_v37  ;;  %vm131_vm14 = vcmp.eq.s32.totalorder %v670_v34, %v115_v1  ;;  %v276_v1 = vld [vmem:[#allocation5 + $0x78] sm:$0xff] }
  0xa3   :  { %398 = vmatmul.msk.f32.gmra.mxu0 %vm120_vm9, %v535_v37 }
  0xa8   :  { %v91_v2 = vpop.permute.xlu0 %90 }
  0xa9   :  { %vm123_vm15 = vcmp.eq.s32.totalorder %v670_v34, %v91_v2 }
  0xaa   :  { %407 = vmatmul.msk.f32.gmra.mxu2 %vm129_vm10, %v535_v37 }
  0xab   :  { %399 = vmatmul.msk.f32.gmra.mxu0 %vm121_vm11, %v535_v37 }
  0xb2   :  { %408 = vmatmul.msk.f32.gmra.mxu2 %vm130_vm12, %v535_v37 }
  0xb3   :  { %400 = vmatmul.msk.f32.gmra.mxu0 %vm122_vm13, %v535_v37 }
  0xba   :  { %409 = vmatmul.msk.f32.gmra.mxu2 %vm131_vm14, %v535_v37 }
  0xbb   :  { %401 = vmatmul.msk.f32.gmra.mxu0 %vm123_vm15, %v535_v37 }
 0x100   :  { %v197_v4 = vpop.f32.mrf.mxu0 }
 0x101   :  { %293 = vmatmul.f32.vlgmr.msra.gmra.mxu1 %v197_v4 }
 0x105   :  { %v221_v5 = vpop.f32.mrf.mxu2 }
 0x106   :  { %317 = vmatmul.f32.vlgmr.msra.gmra.mxu3 %v221_v5 }
 0x108   :  { %v200_v6 = vpop.f32.mrf.mxu0 }
 0x109   :  { %296 = vmatmul.f32.gmra.mxu1 %v200_v6 }
 0x10d   :  { %v224_v7 = vpop.f32.mrf.mxu2 }
 0x10e   :  { %320 = vmatmul.f32.gmra.mxu3 %v224_v7 }
 0x110   :  { %v203_v8 = vpop.f32.mrf.mxu0 }
 0x111   :  { %299 = vmatmul.f32.gmra.mxu1 %v203_v8 }
 0x115   :  { %v227_v9 = vpop.f32.mrf.mxu2 }
 0x116   :  { %323 = vmatmul.f32.gmra.mxu3 %v227_v9 }
 0x118   :  { %v206_v10 = vpop.f32.mrf.mxu0 }
 0x119   :  { %302 = vmatmul.f32.gmra.mxu1 %v206_v10 }
 0x11d   :  { %v230_v11 = vpop.f32.mrf.mxu2 }
 0x11e   :  { %326 = vmatmul.f32.gmra.mxu3 %v230_v11 }
 0x120   :  { %v209_v12 = vpop.f32.mrf.mxu0 }
 0x121   :  { %305 = vmatmul.f32.gmra.mxu1 %v209_v12 }
 0x125   :  { %v233_v13 = vpop.f32.mrf.mxu2 }
 0x126   :  { %329 = vmatmul.f32.gmra.mxu3 %v233_v13 }
 0x128   :  { %v212_v14 = vpop.f32.mrf.mxu0 }
 0x129   :  { %308 = vmatmul.f32.gmra.mxu1 %v212_v14 }
 0x12d   :  { %v236_v15 = vpop.f32.mrf.mxu2 }
 0x12e   :  { %332 = vmatmul.f32.gmra.mxu3 %v236_v15 }
 0x130   :  { %v215_v16 = vpop.f32.mrf.mxu0 }
 0x131   :  { %311 = vmatmul.f32.gmra.mxu1 %v215_v16 }
 0x135   :  { %v239_v17 = vpop.f32.mrf.mxu2 }
 0x136   :  { %335 = vmatmul.f32.gmra.mxu3 %v239_v17 }
 0x138   :  { %v218_v18 = vpop.f32.mrf.mxu0 }
 0x139   :  { %314 = vmatmul.f32.gmra.mxu1 %v218_v18 }
 0x13d   :  { %v242_v19 = vpop.f32.mrf.mxu2 }
 0x13e   :  { %338 = vmatmul.f32.gmra.mxu3 %v242_v19 }
 0x17e   :  { %v294_v21 = vpop.f32.mrf.mxu1 }
 0x17f   :  { %v295_v22 = vadd.f32 %v294_v21, %v261_v20 }
 0x181   :  { %342 = vst [vmem:[#allocation7] sm:$0xff] %v295_v22 }
 0x186   :  { %v297_v24 = vpop.f32.mrf.mxu1 }
 0x187   :  { %v298_v25 = vadd.f32 %v297_v24, %v262_v23 }
 0x189   :  { %343 = vst [vmem:[#allocation7 + $0x8] sm:$0xff] %v298_v25  ;;  %v318_v27 = vpop.f32.mrf.mxu3 }
 0x18a   :  { %v319_v28 = vadd.f32 %v318_v27, %v269_v26 }
 0x18c   :  { %350 = vst [vmem:[#allocation7 + $0x40] sm:$0xff] %v319_v28 }
 0x18e   :  { %v300_v30 = vpop.f32.mrf.mxu1 }
 0x18f   :  { %v301_v31 = vadd.f32 %v300_v30, %v263_v29 }
 0x191   :  { %344 = vst [vmem:[#allocation7 + $0x10] sm:$0xff] %v301_v31  ;;  %v321_v33 = vpop.f32.mrf.mxu3 }
 0x192   :  { %v322_v34 = vadd.f32 %v321_v33, %v270_v32 }
 0x194   :  { %351 = vst [vmem:[#allocation7 + $0x48] sm:$0xff] %v322_v34 }
 0x196   :  { %v303_v36 = vpop.f32.mrf.mxu1 }
 0x197   :  { %v304_v37 = vadd.f32 %v303_v36, %v264_v35 }
 0x199   :  { %345 = vst [vmem:[#allocation7 + $0x18] sm:$0xff] %v304_v37  ;;  %v324_v39 = vpop.f32.mrf.mxu3 }
 0x19a   :  { %v325_v40 = vadd.f32 %v324_v39, %v271_v38 }
 0x19c   :  { %352 = vst [vmem:[#allocation7 + $0x50] sm:$0xff] %v325_v40 }
 0x19e   :  { %v306_v42 = vpop.f32.mrf.mxu1 }
 0x19f   :  { %v307_v43 = vadd.f32 %v306_v42, %v265_v41 }
 0x1a1   :  { %346 = vst [vmem:[#allocation7 + $0x20] sm:$0xff] %v307_v43  ;;  %v327_v45 = vpop.f32.mrf.mxu3 }
 0x1a2   :  { %v328_v46 = vadd.f32 %v327_v45, %v272_v44 }
 0x1a4   :  { %353 = vst [vmem:[#allocation7 + $0x58] sm:$0xff] %v328_v46 }
 0x1a6   :  { %v309_v48 = vpop.f32.mrf.mxu1 }
 0x1a7   :  { %v310_v49 = vadd.f32 %v309_v48, %v266_v47 }
 0x1a9   :  { %347 = vst [vmem:[#allocation7 + $0x28] sm:$0xff] %v310_v49  ;;  %v330_v51 = vpop.f32.mrf.mxu3 }
 0x1aa   :  { %v331_v52 = vadd.f32 %v330_v51, %v273_v50 }
 0x1ac   :  { %354 = vst [vmem:[#allocation7 + $0x60] sm:$0xff] %v331_v52 }
 0x1ae   :  { %v312_v54 = vpop.f32.mrf.mxu1 }
 0x1af   :  { %v313_v55 = vadd.f32 %v312_v54, %v267_v53 }
 0x1b1   :  { %348 = vst [vmem:[#allocation7 + $0x30] sm:$0xff] %v313_v55  ;;  %v333_v57 = vpop.f32.mrf.mxu3 }
 0x1b2   :  { %v334_v58 = vadd.f32 %v333_v57, %v274_v56 }
 0x1b4   :  { %355 = vst [vmem:[#allocation7 + $0x68] sm:$0xff] %v334_v58 }
 0x1b6   :  { %v315_v60 = vpop.f32.mrf.mxu1 }
 0x1b7   :  { %v316_v61 = vadd.f32 %v315_v60, %v268_v59 }
 0x1b9   :  { %349 = vst [vmem:[#allocation7 + $0x38] sm:$0xff] %v316_v61  ;;  %v336_v63 = vpop.f32.mrf.mxu3 }
 0x1ba   :  { %v337_v0 = vadd.f32 %v336_v63, %v275_v62 }
 0x1bc   :  { %356 = vst [vmem:[#allocation7 + $0x70] sm:$0xff] %v337_v0 }
 0x1c1   :  { %v339_v2 = vpop.f32.mrf.mxu3 }
 0x1c2   :  { %v340_v3 = vadd.f32 %v339_v2, %v276_v1 }
 0x1c4   :  { %357 = vst [vmem:[#allocation7 + $0x78] sm:$0xff] %v340_v3 }
 0x1c5   :  { %370 = dma.vmem_to_hbm [thread:$0]  %s363_s10, 2048, %s365_s13, [#allocation4], %s531_s23, %s531_s23, %s532_s24  }
 0x1c6   :  { %528 = dma.done.wait [#allocation4], 2048  }
 0x1c7   :  { %529 = vsyncadd [#allocation4], 4294965248 }
 0x1c8   :  { %375 = vsyncpa [#allocation3], 1 }
 0x1c9   :  { %376 = vsyncpa [#allocation6], 1 }
 0x1ca   :  { %377 = vsyncpa [#allocation4], 1 }

</bundles_post_ra>
